<compile_context>
chip_gen: v5e
topology: v5e:2x2
jax: 0.10.0
libtpu: 0.0.40
codegen_flags: <defaults>
</compile_context>

<pallas_src>
import functools

import jax
import jax.numpy as jnp
from jax.experimental import pallas as pl
from jax.experimental.pallas import tpu as pltpu


# ----------------------------------------------------------------------------
# Helpers
# ----------------------------------------------------------------------------
def _layer_norm(z, gamma, beta, eps=1e-5):
    mean = jnp.mean(z, axis=-1, keepdims=True)
    var = jnp.mean((z - mean) ** 2, axis=-1, keepdims=True)  # biased, as in torch
    return (z - mean) * jax.lax.rsqrt(var + eps) * gamma + beta


def _clamp_vmem(nbytes, floor=16 << 20, cap=48 << 20):
    # Cap below v7x's 64 MiB/TC so double-buffering + compiler scratch fit.
    return int(min(max(int(nbytes), floor), cap))


def _resident_spec(a):
    """Full-array block with a constant index map: DMA'd once, kept resident."""
    ndim = a.ndim
    return pl.BlockSpec(a.shape, lambda b: (0,) * ndim)


# ----------------------------------------------------------------------------
# Encoder layer kernel (one batch element per grid step, "parallel" axis)
# ----------------------------------------------------------------------------
def encoder_layer_kernel(
    x_ref,
    wq_ref, bq_ref, wk_ref, bkT_ref, wv_ref, bv_ref,
    g1_ref, be1_ref,
    w1_ref, b1_ref, w2_ref, b2_ref,
    g2_ref, be2_ref,
    out_ref,
    attn_scratch,
    *, num_heads,
):
    xb = x_ref[...]                                  # (S, D) bf16 block
    x = xb.astype(jnp.float32)
    seq_len, d_model = xb.shape
    d_head = d_model // num_heads
    scale = 1.0 / (float(d_model) ** 0.5)            # matches `/ d_model ** 0.5`

    # Heads live on the batch axis of 3-D einsums; the head split is baked into
    # the weight layout (H, D, d_head) prepared once per layer in the wrapper,
    # so no in-kernel lane-splitting reshape of activations is needed.
    xh = jnp.broadcast_to(xb[None, :, :], (num_heads, seq_len, d_model))

    # Per-head projections (f32 accumulation, f32 bias adds / scaling).
    qh = (jnp.einsum("hsd,hdf->hsf", xh, wq_ref[...],
                     preferred_element_type=jnp.float32) + bq_ref[...]) * scale
    # K is produced pre-transposed: (H, d_head, S), so the score matmul needs
    # no implicit transpose on the MXU feed path.
    khT = jnp.einsum("hdf,hsd->hfs", wk_ref[...], xh,
                     preferred_element_type=jnp.float32) + bkT_ref[...]
    vh = jnp.einsum("hsd,hdf->hsf", xh, wv_ref[...],
                    preferred_element_type=jnp.float32) + bv_ref[...]

    # Scores contract over d_head only (no wasted MXU FLOPs).
    # TODO(synk): at real S/H, tile the KV axis flash-style (online softmax) so
    #             the (H,S,S) scores and the (H,S,D) broadcast of x never
    #             materialize in VMEM.
    s = jnp.einsum("hqf,hfk->hqk", qh.astype(jnp.bfloat16),
                   khT.astype(jnp.bfloat16),
                   preferred_element_type=jnp.float32)           # (H, S, S)
    s = s - jnp.max(s, axis=-1, keepdims=True)
    p = jnp.exp(s)
    p = p * pl.reciprocal(jnp.sum(p, axis=-1, keepdims=True), approx=True)
    ctx = jnp.einsum("hqk,hkf->hqf", p.astype(jnp.bfloat16),
                     vh.astype(jnp.bfloat16),
                     preferred_element_type=jnp.float32)         # (H, S, d_head)

    # Merge heads back to (S, D): H cheap lane-slice stores into VMEM scratch
    # (no lane-axis concatenate, no sum-over-heads).
    for h in range(num_heads):
        attn_scratch[:, h * d_head:(h + 1) * d_head] = ctx[h]
    attn = attn_scratch[...]

    # residual + LayerNorm 1 (f32)
    h1 = _layer_norm(x + attn, g1_ref[...], be1_ref[...])

    # feed-forward: Linear -> ReLU -> Linear (bf16 MXU operands, f32 accum)
    # TODO(synk): at real sizes add row tiling (256-multiples) and an
    #             "arbitrary" K-reduction grid axis over the 4*D hidden dim
    #             with a pl.when-initialized f32 accumulator.
    ff = jnp.maximum(
        jnp.dot(h1.astype(jnp.bfloat16), w1_ref[...],
                preferred_element_type=jnp.float32) + b1_ref[...],
        0.0,
    )
    ff = jnp.dot(ff.astype(jnp.bfloat16), w2_ref[...],
                 preferred_element_type=jnp.float32) + b2_ref[...]

    # residual + LayerNorm 2 (f32), emit bf16 activations for the next layer.
    out_ref[...] = _layer_norm(h1 + ff, g2_ref[...], be2_ref[...]).astype(out_ref.dtype)


def _encoder_vmem_limit(args, seq_len, d_model, num_heads):
    w_bytes = sum(int(a.size) * a.dtype.itemsize for a in args[1:])
    d_head = d_model // num_heads
    inter = (
        4 * seq_len * d_model * 2                      # x/out blocks (bf16, 2x buffered)
        + num_heads * seq_len * d_model * 2            # broadcast x (bf16)
        + 3 * num_heads * seq_len * d_head * 4         # q, k^T, v (f32)
        + 2 * num_heads * seq_len * seq_len * 4        # scores + probs (f32)
        + 6 * seq_len * d_model * 4                    # attn scratch / residual / LN temps
        + 2 * seq_len * 4 * d_model * 4                # FFN hidden (f32)
    )
    return _clamp_vmem(2 * w_bytes + 2 * inter)


def encoder_layer(x2, kp, num_heads, seq_len):
    n_rows, d_model = x2.shape
    batch = n_rows // seq_len

    args = (
        x2,
        kp["wq_h"], kp["bq_h"], kp["wk_h"], kp["bkT_h"], kp["wv_h"], kp["bv_h"],
        kp["g1"], kp["be1"],
        kp["w1"], kp["b1"], kp["w2"], kp["b2"],
        kp["g2"], kp["be2"],
    )
    in_specs = [pl.BlockSpec((seq_len, d_model), lambda b: (b, 0))]
    in_specs += [_resident_spec(a) for a in args[1:]]

    # TODO(synk): hide layer l+1 weight HBM->VMEM DMA behind layer l compute via
    #             the cross-pallas_call semaphore/VMEM-future pattern (P10).
    return pl.pallas_call(
        functools.partial(encoder_layer_kernel, num_heads=num_heads),
        out_shape=jax.ShapeDtypeStruct((n_rows, d_model), jnp.bfloat16),
        grid=(batch,),
        in_specs=in_specs,
        out_specs=pl.BlockSpec((seq_len, d_model), lambda b: (b, 0)),
        scratch_shapes=[pltpu.VMEM((seq_len, d_model), jnp.float32)],
        compiler_params=pltpu.CompilerParams(
            dimension_semantics=("parallel",),
            vmem_limit_bytes=_encoder_vmem_limit(args, seq_len, d_model, num_heads)),
    )(*args)


# ----------------------------------------------------------------------------
# Decoder (vocab projection), fixed lane-dense vocab tile + cdiv grid
# ----------------------------------------------------------------------------
def decoder_kernel(x_ref, w_ref, b_ref, out_ref):
    out_ref[...] = (
        jnp.dot(x_ref[...], w_ref[...], preferred_element_type=jnp.float32)
        + b_ref[...]
    )


def decoder(x2, w, b):
    n_rows, d_model = x2.shape
    vocab = w.shape[1]

    # Fixed lane-dense tile (multiple of 128, up to 512); pad vocab to the tile
    # multiple so every output store is an unmasked lane-dense vst.
    tile_v = min(512, pl.cdiv(vocab, 128) * 128)
    v_pad = pl.cdiv(vocab, tile_v) * tile_v
    if v_pad != vocab:
        w = jnp.pad(w, ((0, 0), (0, v_pad - vocab)))
        b = jnp.pad(b, ((0, 0), (0, v_pad - vocab)))
    grid = (v_pad // tile_v,)

    resident = (n_rows * d_model * 2                 # x (bf16), resident
                + 2 * (d_model * tile_v * 2          # W tile (bf16), 2x buffered
                       + tile_v * 4                  # bias tile (f32)
                       + n_rows * tile_v * 4))       # out tile (f32)

    # TODO(synk): on v5e (HBM/store-bound first) consider
    #             pipeline_mode=pl.Buffered(3) on the streamed weight-tile spec
    #             and row tiling of x at real n_rows.
    out = pl.pallas_call(
        decoder_kernel,
        out_shape=jax.ShapeDtypeStruct((n_rows, v_pad), jnp.float32),
        grid=grid,
        in_specs=[
            pl.BlockSpec((n_rows, d_model), lambda j: (0, 0)),
            pl.BlockSpec((d_model, tile_v), lambda j: (0, j)),
            pl.BlockSpec((1, tile_v), lambda j: (0, j)),
        ],
        out_specs=pl.BlockSpec((n_rows, tile_v), lambda j: (0, j)),
        compiler_params=pltpu.CompilerParams(
            dimension_semantics=("parallel",),
            vmem_limit_bytes=_clamp_vmem(4 * resident)),
    )(x2, w, b)
    return out[:, :vocab]


# ----------------------------------------------------------------------------
# Per-layer weight layout prep (outside the kernels; pure layout plumbing)
# ----------------------------------------------------------------------------
def _prep_layer(p, num_heads):
    d_model = p["wq"].shape[0]
    d_head = d_model // num_heads

    def split_w(w):   # (D, D) -> (H, D, d_head)
        return w.reshape(d_model, num_heads, d_head).transpose(1, 0, 2)

    def split_b(b):   # (1, D) -> (H, 1, d_head)
        return b.reshape(num_heads, d_head)[:, None, :]

    return dict(
        wq_h=split_w(p["wq"]), bq_h=split_b(p["bq"]),
        wk_h=split_w(p["wk"]), bkT_h=jnp.swapaxes(split_b(p["bk"]), 1, 2),  # (H, d_head, 1)
        wv_h=split_w(p["wv"]), bv_h=split_b(p["bv"]),
        g1=p["g1"], be1=p["be1"],
        w1=p["w1"], b1=p["b1"], w2=p["w2"], b2=p["b2"],
        g2=p["g2"], be2=p["be2"],
    )


# ----------------------------------------------------------------------------
# Parameter init (deterministic, synthetic).  Weights stored bf16, the rest f32.
# ----------------------------------------------------------------------------
def init_params(key, vocab_size, d_model, num_layers, max_seq_len):
    keys = jax.random.split(key, 3 + num_layers)

    def w(k, shape):
        return (0.02 * jax.random.normal(k, shape, jnp.float32)).astype(jnp.bfloat16)

    tok_emb = 0.02 * jax.random.normal(keys[0], (vocab_size, d_model), jnp.float32)
    pos_emb = 0.02 * jax.random.normal(keys[1], (max_seq_len, d_model), jnp.float32)
    dec_w = w(keys[2], (d_model, vocab_size))
    dec_b = jnp.zeros((1, vocab_size), jnp.float32)

    layers = []
    for li in range(num_layers):
        lk = jax.random.split(keys[3 + li], 5)
        d4 = 4 * d_model
        layers.append(dict(
            wq=w(lk[0], (d_model, d_model)), bq=jnp.zeros((1, d_model), jnp.float32),
            wk=w(lk[1], (d_model, d_model)), bk=jnp.zeros((1, d_model), jnp.float32),
            wv=w(lk[2], (d_model, d_model)), bv=jnp.zeros((1, d_model), jnp.float32),
            g1=jnp.ones((1, d_model), jnp.float32),
            be1=jnp.zeros((1, d_model), jnp.float32),
            w1=w(lk[3], (d_model, d4)), b1=jnp.zeros((1, d4), jnp.float32),
            w2=w(lk[4], (d4, d_model)), b2=jnp.zeros((1, d_model), jnp.float32),
            g2=jnp.ones((1, d_model), jnp.float32),
            be2=jnp.zeros((1, d_model), jnp.float32),
        ))
    return dict(tok_emb=tok_emb, pos_emb=pos_emb, dec_w=dec_w, dec_b=dec_b,
                layers=layers)


def gpt2_forward(params, input_ids, num_heads):
    # Embedding gather stays in plain JAX (glue); the matmul/softmax/LN hot path
    # runs inside the Pallas kernels on (B*S, D) bf16 activations.
    B, S = input_ids.shape
    D = params["tok_emb"].shape[1]
    x = params["tok_emb"][input_ids] + params["pos_emb"][jnp.arange(S)][None, :, :]
    x2 = x.reshape(B * S, D).astype(jnp.bfloat16)
    for lp in params["layers"]:
        kp = _prep_layer(lp, num_heads)
        x2 = encoder_layer(x2, kp, num_heads, seq_len=S)
    logits2 = decoder(x2, params["dec_w"], params["dec_b"])
    return logits2.reshape(B, S, -1)


# ----------------------------------------------------------------------------
# Pure-JAX reference (same math, f32 activations, same bf16-valued weights)
# ----------------------------------------------------------------------------
def gpt2_reference(params, input_ids, num_heads):
    f32 = lambda a: a.astype(jnp.float32)
    B, S = input_ids.shape
    x = params["tok_emb"][input_ids] + params["pos_emb"][jnp.arange(S)][None, :, :]
    for p in params["layers"]:
        D = x.shape[-1]
        dh = D // num_heads
        q = x @ f32(p["wq"]) + p["bq"]
        k = x @ f32(p["wk"]) + p["bk"]
        v = x @ f32(p["wv"]) + p["bv"]
        qh = q.reshape(B, S, num_heads, dh).transpose(0, 2, 1, 3)
        kh = k.reshape(B, S, num_heads, dh).transpose(0, 2, 1, 3)
        vh = v.reshape(B, S, num_heads, dh).transpose(0, 2, 1, 3)
        sc = jnp.einsum("bhqd,bhkd->bhqk", qh, kh) / (D ** 0.5)
        w = jax.nn.softmax(sc, axis=-1)
        ctx = jnp.einsum("bhqk,bhkd->bhqd", w, vh).transpose(0, 2, 1, 3).reshape(B, S, D)
        h1 = _layer_norm(x + ctx, p["g1"], p["be1"])
        ff = jnp.maximum(h1 @ f32(p["w1"]) + p["b1"], 0.0) @ f32(p["w2"]) + p["b2"]
        x = _layer_norm(h1 + ff, p["g2"], p["be2"])
    return x @ f32(params["dec_w"]) + params["dec_b"]


if __name__ == "__main__":
    # small, forward-consistent shapes
    B, S = 2, 8
    D_MODEL, NUM_HEADS, NUM_LAYERS = 32, 4, 2
    VOCAB, MAX_LEN = 600, 16          # non-128-multiple vocab exercises padding + 2 tiles

    key = jax.random.PRNGKey(0)
    kp, ki = jax.random.split(key)
    params = init_params(kp, VOCAB, D_MODEL, NUM_LAYERS, MAX_LEN)
    input_ids = jax.random.randint(ki, (B, S), 0, VOCAB, dtype=jnp.int32)

    logits = gpt2_forward(params, input_ids, NUM_HEADS)
    logits = jax.block_until_ready(logits)

    ref = gpt2_reference(params, input_ids, NUM_HEADS)
    assert logits.shape == (B, S, VOCAB)
    assert bool(jnp.all(jnp.isfinite(logits)))
    assert jnp.allclose(logits, ref, atol=3e-2, rtol=3e-2)

    print("KERNEL_OK")
</pallas_src>

<mosaic_0001>
module attributes {stable_mosaic.version = 11 : i64} {
  func.func @encoder_layer_kernel(%arg0: i32, %arg1: memref<8x32xbf16, #tpu.memory_space<vmem>>, %arg2: memref<4x32x8xbf16, #tpu.memory_space<vmem>>, %arg3: memref<4x1x8xf32, #tpu.memory_space<vmem>>, %arg4: memref<4x32x8xbf16, #tpu.memory_space<vmem>>, %arg5: memref<4x8x1xf32, #tpu.memory_space<vmem>>, %arg6: memref<4x32x8xbf16, #tpu.memory_space<vmem>>, %arg7: memref<4x1x8xf32, #tpu.memory_space<vmem>>, %arg8: memref<1x32xf32, #tpu.memory_space<vmem>>, %arg9: memref<1x32xf32, #tpu.memory_space<vmem>>, %arg10: memref<32x128xbf16, #tpu.memory_space<vmem>>, %arg11: memref<1x128xf32, #tpu.memory_space<vmem>>, %arg12: memref<128x32xbf16, #tpu.memory_space<vmem>>, %arg13: memref<1x32xf32, #tpu.memory_space<vmem>>, %arg14: memref<1x32xf32, #tpu.memory_space<vmem>>, %arg15: memref<1x32xf32, #tpu.memory_space<vmem>>, %arg16: memref<8x32xbf16, #tpu.memory_space<vmem>>, %arg17: memref<8x32xf32, #tpu.memory_space<vmem>>) attributes {dimension_semantics = [#tpu.dimension_semantics<parallel>], iteration_bounds = array<i64: 2>, scalar_prefetch = 0 : i64, scratch_operands = 1 : i64, tpu.core_type = #tpu.core_type<tc>, window_params = [{transform_indices = @transform_0, window_bounds = array<i64: 8, 32>}, {pipeline_mode = #tpu.pipeline_mode<synchronous>, transform_indices = @transform_1, window_bounds = array<i64: 4, 32, 8>}, {pipeline_mode = #tpu.pipeline_mode<synchronous>, transform_indices = @transform_2, window_bounds = array<i64: 4, 1, 8>}, {pipeline_mode = #tpu.pipeline_mode<synchronous>, transform_indices = @transform_3, window_bounds = array<i64: 4, 32, 8>}, {pipeline_mode = #tpu.pipeline_mode<synchronous>, transform_indices = @transform_4, window_bounds = array<i64: 4, 8, 1>}, {pipeline_mode = #tpu.pipeline_mode<synchronous>, transform_indices = @transform_5, window_bounds = array<i64: 4, 32, 8>}, {pipeline_mode = #tpu.pipeline_mode<synchronous>, transform_indices = @transform_6, window_bounds = array<i64: 4, 1, 8>}, {pipeline_mode = #tpu.pipeline_mode<synchronous>, transform_indices = @transform_7, window_bounds = array<i64: 1, 32>}, {pipeline_mode = #tpu.pipeline_mode<synchronous>, transform_indices = @transform_8, window_bounds = array<i64: 1, 32>}, {pipeline_mode = #tpu.pipeline_mode<synchronous>, transform_indices = @transform_9, window_bounds = array<i64: 32, 128>}, {pipeline_mode = #tpu.pipeline_mode<synchronous>, transform_indices = @transform_10, window_bounds = array<i64: 1, 128>}, {pipeline_mode = #tpu.pipeline_mode<synchronous>, transform_indices = @transform_11, window_bounds = array<i64: 128, 32>}, {pipeline_mode = #tpu.pipeline_mode<synchronous>, transform_indices = @transform_12, window_bounds = array<i64: 1, 32>}, {pipeline_mode = #tpu.pipeline_mode<synchronous>, transform_indices = @transform_13, window_bounds = array<i64: 1, 32>}, {pipeline_mode = #tpu.pipeline_mode<synchronous>, transform_indices = @transform_14, window_bounds = array<i64: 1, 32>}, {transform_indices = @transform_15, window_bounds = array<i64: 8, 32>}]} {
    %c0 = arith.constant 0 : index
    %c0_0 = arith.constant 0 : index
    %0 = vector.load %arg1[%c0, %c0_0] : memref<8x32xbf16, #tpu.memory_space<vmem>>, vector<8x32xbf16>
    %1 = arith.extf %0 : vector<8x32xbf16> to vector<8x32xf32>
    %2 = vector.shape_cast %0 : vector<8x32xbf16> to vector<1x8x32xbf16>
    %3 = vector.shape_cast %2 : vector<1x8x32xbf16> to vector<1x8x32xbf16>
    %4 = vector.broadcast %3 : vector<1x8x32xbf16> to vector<4x8x32xbf16>
    %c0_1 = arith.constant 0 : index
    %c0_2 = arith.constant 0 : index
    %c0_3 = arith.constant 0 : index
    %5 = vector.load %arg2[%c0_1, %c0_2, %c0_3] : memref<4x32x8xbf16, #tpu.memory_space<vmem>>, vector<4x32x8xbf16>
    "tpu.trace_start"() <{level = 10 : i32, message = "hsd,hdf->hsf"}> : () -> ()
    %cst = arith.constant dense<0.000000e+00> : vector<4x8x8xf32>
    %6 = tpu.matmul %4, %5, %cst {dimension_numbers = #tpu.dot_dimension_numbers<[2], [1], [1], [2], [0, 0, 0, 1, 1, 2], [0], [0]>} : vector<4x8x32xbf16>, vector<4x32x8xbf16>, vector<4x8x8xf32> -> vector<4x8x8xf32>
    "tpu.trace_stop"() : () -> ()
    %c0_4 = arith.constant 0 : index
    %c0_5 = arith.constant 0 : index
    %c0_6 = arith.constant 0 : index
    %7 = vector.load %arg3[%c0_4, %c0_5, %c0_6] : memref<4x1x8xf32, #tpu.memory_space<vmem>>, vector<4x1x8xf32>
    %8 = vector.broadcast %7 : vector<4x1x8xf32> to vector<4x8x8xf32>
    %9 = arith.addf %6, %8 : vector<4x8x8xf32>
    %cst_7 = arith.constant 0.176776692 : f32
    %10 = vector.broadcast %cst_7 : f32 to vector<4x8x8xf32>
    %11 = arith.mulf %9, %10 : vector<4x8x8xf32>
    %c0_8 = arith.constant 0 : index
    %c0_9 = arith.constant 0 : index
    %c0_10 = arith.constant 0 : index
    %12 = vector.load %arg4[%c0_8, %c0_9, %c0_10] : memref<4x32x8xbf16, #tpu.memory_space<vmem>>, vector<4x32x8xbf16>
    "tpu.trace_start"() <{level = 10 : i32, message = "hdf,hsd->hfs"}> : () -> ()
    %cst_11 = arith.constant dense<0.000000e+00> : vector<4x8x8xf32>
    %13 = tpu.matmul %12, %4, %cst_11 {dimension_numbers = #tpu.dot_dimension_numbers<[1], [2], [2], [1], [0, 0, 0, 2, 1, 1], [0], [0]>} : vector<4x32x8xbf16>, vector<4x8x32xbf16>, vector<4x8x8xf32> -> vector<4x8x8xf32>
    "tpu.trace_stop"() : () -> ()
    %c0_12 = arith.constant 0 : index
    %c0_13 = arith.constant 0 : index
    %c0_14 = arith.constant 0 : index
    %14 = vector.load %arg5[%c0_12, %c0_13, %c0_14] : memref<4x8x1xf32, #tpu.memory_space<vmem>>, vector<4x8x1xf32>
    %15 = vector.broadcast %14 : vector<4x8x1xf32> to vector<4x8x8xf32>
    %16 = arith.addf %13, %15 : vector<4x8x8xf32>
    %c0_15 = arith.constant 0 : index
    %c0_16 = arith.constant 0 : index
    %c0_17 = arith.constant 0 : index
    %17 = vector.load %arg6[%c0_15, %c0_16, %c0_17] : memref<4x32x8xbf16, #tpu.memory_space<vmem>>, vector<4x32x8xbf16>
    "tpu.trace_start"() <{level = 10 : i32, message = "hsd,hdf->hsf"}> : () -> ()
    %cst_18 = arith.constant dense<0.000000e+00> : vector<4x8x8xf32>
    %18 = tpu.matmul %4, %17, %cst_18 {dimension_numbers = #tpu.dot_dimension_numbers<[2], [1], [1], [2], [0, 0, 0, 1, 1, 2], [0], [0]>} : vector<4x8x32xbf16>, vector<4x32x8xbf16>, vector<4x8x8xf32> -> vector<4x8x8xf32>
    "tpu.trace_stop"() : () -> ()
    %c0_19 = arith.constant 0 : index
    %c0_20 = arith.constant 0 : index
    %c0_21 = arith.constant 0 : index
    %19 = vector.load %arg7[%c0_19, %c0_20, %c0_21] : memref<4x1x8xf32, #tpu.memory_space<vmem>>, vector<4x1x8xf32>
    %20 = vector.broadcast %19 : vector<4x1x8xf32> to vector<4x8x8xf32>
    %21 = arith.addf %18, %20 : vector<4x8x8xf32>
    %22 = arith.truncf %11 : vector<4x8x8xf32> to vector<4x8x8xbf16>
    %23 = arith.truncf %16 : vector<4x8x8xf32> to vector<4x8x8xbf16>
    "tpu.trace_start"() <{level = 10 : i32, message = "hqf,hfk->hqk"}> : () -> ()
    %cst_22 = arith.constant dense<0.000000e+00> : vector<4x8x8xf32>
    %24 = tpu.matmul %22, %23, %cst_22 {dimension_numbers = #tpu.dot_dimension_numbers<[2], [1], [1], [2], [0, 0, 0, 1, 1, 2], [0], [0]>} : vector<4x8x8xbf16>, vector<4x8x8xbf16>, vector<4x8x8xf32> -> vector<4x8x8xf32>
    "tpu.trace_stop"() : () -> ()
    %cst_23 = arith.constant dense<0xFF800000> : vector<4x8xf32>
    %25 = vector.multi_reduction <maximumf>, %24, %cst_23 [2] : vector<4x8x8xf32> to vector<4x8xf32>
    %26 = vector.shape_cast %25 : vector<4x8xf32> to vector<4x8x1xf32>
    %27 = vector.broadcast %26 : vector<4x8x1xf32> to vector<4x8x8xf32>
    %28 = arith.subf %24, %27 : vector<4x8x8xf32>
    %29 = math.exp %28 : vector<4x8x8xf32>
    %cst_24 = arith.constant dense<0.000000e+00> : vector<4x8xf32>
    %30 = vector.multi_reduction <add>, %29, %cst_24 [2] : vector<4x8x8xf32> to vector<4x8xf32>
    %31 = vector.shape_cast %30 : vector<4x8xf32> to vector<4x8x1xf32>
    %32 = tpu.reciprocal %31 {approx = true} : vector<4x8x1xf32> -> vector<4x8x1xf32>
    %33 = vector.broadcast %32 : vector<4x8x1xf32> to vector<4x8x8xf32>
    %34 = arith.mulf %29, %33 : vector<4x8x8xf32>
    %35 = arith.truncf %34 : vector<4x8x8xf32> to vector<4x8x8xbf16>
    %36 = arith.truncf %21 : vector<4x8x8xf32> to vector<4x8x8xbf16>
    "tpu.trace_start"() <{level = 10 : i32, message = "hqk,hkf->hqf"}> : () -> ()
    %cst_25 = arith.constant dense<0.000000e+00> : vector<4x8x8xf32>
    %37 = tpu.matmul %35, %36, %cst_25 {dimension_numbers = #tpu.dot_dimension_numbers<[2], [1], [1], [2], [0, 0, 0, 1, 1, 2], [0], [0]>} : vector<4x8x8xbf16>, vector<4x8x8xbf16>, vector<4x8x8xf32> -> vector<4x8x8xf32>
    "tpu.trace_stop"() : () -> ()
    %38 = vector.extract_strided_slice %37 {offsets = [0, 0, 0], sizes = [1, 8, 8], strides = [1, 1, 1]} : vector<4x8x8xf32> to vector<1x8x8xf32>
    %39 = vector.shape_cast %38 : vector<1x8x8xf32> to vector<8x8xf32>
    %c0_26 = arith.constant 0 : index
    %c0_27 = arith.constant 0 : index
    %40 = vector.load %arg17[%c0_26, %c0_27] : memref<8x32xf32, #tpu.memory_space<vmem>>, vector<8x8xf32>
    tpu.vector_store %arg17[%c0_26, %c0_27], %39 {strides = array<i32>} : memref<8x32xf32, #tpu.memory_space<vmem>>, vector<8x8xf32>,
    %41 = vector.extract_strided_slice %37 {offsets = [1, 0, 0], sizes = [1, 8, 8], strides = [1, 1, 1]} : vector<4x8x8xf32> to vector<1x8x8xf32>
    %42 = vector.shape_cast %41 : vector<1x8x8xf32> to vector<8x8xf32>
    %c0_28 = arith.constant 0 : index
    %c8 = arith.constant 8 : index
    %43 = vector.load %arg17[%c0_28, %c8] : memref<8x32xf32, #tpu.memory_space<vmem>>, vector<8x8xf32>
    tpu.vector_store %arg17[%c0_28, %c8], %42 {strides = array<i32>} : memref<8x32xf32, #tpu.memory_space<vmem>>, vector<8x8xf32>,
    %44 = vector.extract_strided_slice %37 {offsets = [2, 0, 0], sizes = [1, 8, 8], strides = [1, 1, 1]} : vector<4x8x8xf32> to vector<1x8x8xf32>
    %45 = vector.shape_cast %44 : vector<1x8x8xf32> to vector<8x8xf32>
    %c0_29 = arith.constant 0 : index
    %c16 = arith.constant 16 : index
    %46 = vector.load %arg17[%c0_29, %c16] : memref<8x32xf32, #tpu.memory_space<vmem>>, vector<8x8xf32>
    tpu.vector_store %arg17[%c0_29, %c16], %45 {strides = array<i32>} : memref<8x32xf32, #tpu.memory_space<vmem>>, vector<8x8xf32>,
    %47 = vector.extract_strided_slice %37 {offsets = [3, 0, 0], sizes = [1, 8, 8], strides = [1, 1, 1]} : vector<4x8x8xf32> to vector<1x8x8xf32>
    %48 = vector.shape_cast %47 : vector<1x8x8xf32> to vector<8x8xf32>
    %c0_30 = arith.constant 0 : index
    %c24 = arith.constant 24 : index
    %49 = vector.load %arg17[%c0_30, %c24] : memref<8x32xf32, #tpu.memory_space<vmem>>, vector<8x8xf32>
    tpu.vector_store %arg17[%c0_30, %c24], %48 {strides = array<i32>} : memref<8x32xf32, #tpu.memory_space<vmem>>, vector<8x8xf32>,
    %c0_31 = arith.constant 0 : index
    %c0_32 = arith.constant 0 : index
    %50 = vector.load %arg17[%c0_31, %c0_32] : memref<8x32xf32, #tpu.memory_space<vmem>>, vector<8x32xf32>
    %51 = arith.addf %1, %50 : vector<8x32xf32>
    %c0_33 = arith.constant 0 : index
    %c0_34 = arith.constant 0 : index
    %52 = vector.load %arg8[%c0_33, %c0_34] : memref<1x32xf32, #tpu.memory_space<vmem>>, vector<1x32xf32>
    %c0_35 = arith.constant 0 : index
    %c0_36 = arith.constant 0 : index
    %53 = vector.load %arg9[%c0_35, %c0_36] : memref<1x32xf32, #tpu.memory_space<vmem>>, vector<1x32xf32>
    %cst_37 = arith.constant dense<0.000000e+00> : vector<8xf32>
    %54 = vector.multi_reduction <add>, %51, %cst_37 [1] : vector<8x32xf32> to vector<8xf32>
    %55 = vector.shape_cast %54 : vector<8xf32> to vector<8x1xf32>
    %cst_38 = arith.constant 3.200000e+01 : f32
    %56 = vector.broadcast %cst_38 : f32 to vector<8x1xf32>
    %57 = arith.divf %55, %56 : vector<8x1xf32>
    %58 = vector.broadcast %57 : vector<8x1xf32> to vector<8x32xf32>
    %59 = arith.subf %51, %58 : vector<8x32xf32>
    %60 = arith.mulf %59, %59 : vector<8x32xf32>
    %cst_39 = arith.constant dense<0.000000e+00> : vector<8xf32>
    %61 = vector.multi_reduction <add>, %60, %cst_39 [1] : vector<8x32xf32> to vector<8xf32>
    %62 = vector.shape_cast %61 : vector<8xf32> to vector<8x1xf32>
    %cst_40 = arith.constant 3.200000e+01 : f32
    %63 = vector.broadcast %cst_40 : f32 to vector<8x1xf32>
    %64 = arith.divf %62, %63 : vector<8x1xf32>
    %65 = vector.broadcast %57 : vector<8x1xf32> to vector<8x32xf32>
    %66 = arith.subf %51, %65 : vector<8x32xf32>
    %cst_41 = arith.constant 9.99999974E-6 : f32
    %67 = vector.broadcast %cst_41 : f32 to vector<8x1xf32>
    %68 = arith.addf %64, %67 : vector<8x1xf32>
    %69 = math.rsqrt %68 : vector<8x1xf32>
    %70 = vector.broadcast %69 : vector<8x1xf32> to vector<8x32xf32>
    %71 = arith.mulf %66, %70 : vector<8x32xf32>
    %72 = vector.broadcast %52 : vector<1x32xf32> to vector<8x32xf32>
    %73 = arith.mulf %71, %72 : vector<8x32xf32>
    %74 = vector.broadcast %53 : vector<1x32xf32> to vector<8x32xf32>
    %75 = arith.addf %73, %74 : vector<8x32xf32>
    %76 = arith.truncf %75 : vector<8x32xf32> to vector<8x32xbf16>
    %c0_42 = arith.constant 0 : index
    %c0_43 = arith.constant 0 : index
    %77 = vector.load %arg10[%c0_42, %c0_43] : memref<32x128xbf16, #tpu.memory_space<vmem>>, vector<32x128xbf16>
    %cst_44 = arith.constant dense<0.000000e+00> : vector<8x128xf32>
    %78 = tpu.matmul %76, %77, %cst_44 {dimension_numbers = #tpu.dot_dimension_numbers<[1], [0], [0], [1], [0, 0, 1, 1], [], []>} : vector<8x32xbf16>, vector<32x128xbf16>, vector<8x128xf32> -> vector<8x128xf32>
    %c0_45 = arith.constant 0 : index
    %c0_46 = arith.constant 0 : index
    %79 = vector.load %arg11[%c0_45, %c0_46] : memref<1x128xf32, #tpu.memory_space<vmem>>, vector<1x128xf32>
    %80 = vector.broadcast %79 : vector<1x128xf32> to vector<8x128xf32>
    %81 = arith.addf %78, %80 : vector<8x128xf32>
    %cst_47 = arith.constant 0.000000e+00 : f32
    %82 = vector.broadcast %cst_47 : f32 to vector<8x128xf32>
    %83 = arith.maximumf %81, %82 : vector<8x128xf32>
    %84 = arith.truncf %83 : vector<8x128xf32> to vector<8x128xbf16>
    %c0_48 = arith.constant 0 : index
    %c0_49 = arith.constant 0 : index
    %85 = vector.load %arg12[%c0_48, %c0_49] : memref<128x32xbf16, #tpu.memory_space<vmem>>, vector<128x32xbf16>
    %cst_50 = arith.constant dense<0.000000e+00> : vector<8x32xf32>
    %86 = tpu.matmul %84, %85, %cst_50 {dimension_numbers = #tpu.dot_dimension_numbers<[1], [0], [0], [1], [0, 0, 1, 1], [], []>} : vector<8x128xbf16>, vector<128x32xbf16>, vector<8x32xf32> -> vector<8x32xf32>
    %c0_51 = arith.constant 0 : index
    %c0_52 = arith.constant 0 : index
    %87 = vector.load %arg13[%c0_51, %c0_52] : memref<1x32xf32, #tpu.memory_space<vmem>>, vector<1x32xf32>
    %88 = vector.broadcast %87 : vector<1x32xf32> to vector<8x32xf32>
    %89 = arith.addf %86, %88 : vector<8x32xf32>
    %90 = arith.addf %75, %89 : vector<8x32xf32>
    %c0_53 = arith.constant 0 : index
    %c0_54 = arith.constant 0 : index
    %91 = vector.load %arg14[%c0_53, %c0_54] : memref<1x32xf32, #tpu.memory_space<vmem>>, vector<1x32xf32>
    %c0_55 = arith.constant 0 : index
    %c0_56 = arith.constant 0 : index
    %92 = vector.load %arg15[%c0_55, %c0_56] : memref<1x32xf32, #tpu.memory_space<vmem>>, vector<1x32xf32>
    %cst_57 = arith.constant dense<0.000000e+00> : vector<8xf32>
    %93 = vector.multi_reduction <add>, %90, %cst_57 [1] : vector<8x32xf32> to vector<8xf32>
    %94 = vector.shape_cast %93 : vector<8xf32> to vector<8x1xf32>
    %cst_58 = arith.constant 3.200000e+01 : f32
    %95 = vector.broadcast %cst_58 : f32 to vector<8x1xf32>
    %96 = arith.divf %94, %95 : vector<8x1xf32>
    %97 = vector.broadcast %96 : vector<8x1xf32> to vector<8x32xf32>
    %98 = arith.subf %90, %97 : vector<8x32xf32>
    %99 = arith.mulf %98, %98 : vector<8x32xf32>
    %cst_59 = arith.constant dense<0.000000e+00> : vector<8xf32>
    %100 = vector.multi_reduction <add>, %99, %cst_59 [1] : vector<8x32xf32> to vector<8xf32>
    %101 = vector.shape_cast %100 : vector<8xf32> to vector<8x1xf32>
    %cst_60 = arith.constant 3.200000e+01 : f32
    %102 = vector.broadcast %cst_60 : f32 to vector<8x1xf32>
    %103 = arith.divf %101, %102 : vector<8x1xf32>
    %104 = vector.broadcast %96 : vector<8x1xf32> to vector<8x32xf32>
    %105 = arith.subf %90, %104 : vector<8x32xf32>
    %cst_61 = arith.constant 9.99999974E-6 : f32
    %106 = vector.broadcast %cst_61 : f32 to vector<8x1xf32>
    %107 = arith.addf %103, %106 : vector<8x1xf32>
    %108 = math.rsqrt %107 : vector<8x1xf32>
    %109 = vector.broadcast %108 : vector<8x1xf32> to vector<8x32xf32>
    %110 = arith.mulf %105, %109 : vector<8x32xf32>
    %111 = vector.broadcast %91 : vector<1x32xf32> to vector<8x32xf32>
    %112 = arith.mulf %110, %111 : vector<8x32xf32>
    %113 = vector.broadcast %92 : vector<1x32xf32> to vector<8x32xf32>
    %114 = arith.addf %112, %113 : vector<8x32xf32>
    %115 = arith.truncf %114 : vector<8x32xf32> to vector<8x32xbf16>
    %c0_62 = arith.constant 0 : index
    %c0_63 = arith.constant 0 : index
    %116 = vector.load %arg16[%c0_62, %c0_63] : memref<8x32xbf16, #tpu.memory_space<vmem>>, vector<8x32xbf16>
    tpu.vector_store %arg16[%c0_62, %c0_63], %115 {strides = array<i32>} : memref<8x32xbf16, #tpu.memory_space<vmem>>, vector<8x32xbf16>,
    return
  }
  func.func @transform_0(%arg0: i32) -> (i32, i32) {
    %c0_i32 = arith.constant 0 : i32
    %c0_i32_0 = arith.constant 0 : i32
    return %arg0, %c0_i32 : i32, i32
  }
  func.func @transform_1(%arg0: i32) -> (i32, i32, i32) {
    %c0_i32 = arith.constant 0 : i32
    %c0_i32_0 = arith.constant 0 : i32
    %c0_i32_1 = arith.constant 0 : i32
    %c0_i32_2 = arith.constant 0 : i32
    return %c0_i32, %c0_i32_0, %c0_i32_1 : i32, i32, i32
  }
  func.func @transform_2(%arg0: i32) -> (i32, i32, i32) {
    %c0_i32 = arith.constant 0 : i32
    %c0_i32_0 = arith.constant 0 : i32
    %c0_i32_1 = arith.constant 0 : i32
    %c0_i32_2 = arith.constant 0 : i32
    return %c0_i32, %c0_i32_0, %c0_i32_1 : i32, i32, i32
  }
  func.func @transform_3(%arg0: i32) -> (i32, i32, i32) {
    %c0_i32 = arith.constant 0 : i32
    %c0_i32_0 = arith.constant 0 : i32
    %c0_i32_1 = arith.constant 0 : i32
    %c0_i32_2 = arith.constant 0 : i32
    return %c0_i32, %c0_i32_0, %c0_i32_1 : i32, i32, i32
  }
  func.func @transform_4(%arg0: i32) -> (i32, i32, i32) {
    %c0_i32 = arith.constant 0 : i32
    %c0_i32_0 = arith.constant 0 : i32
    %c0_i32_1 = arith.constant 0 : i32
    %c0_i32_2 = arith.constant 0 : i32
    return %c0_i32, %c0_i32_0, %c0_i32_1 : i32, i32, i32
  }
  func.func @transform_5(%arg0: i32) -> (i32, i32, i32) {
    %c0_i32 = arith.constant 0 : i32
    %c0_i32_0 = arith.constant 0 : i32
    %c0_i32_1 = arith.constant 0 : i32
    %c0_i32_2 = arith.constant 0 : i32
    return %c0_i32, %c0_i32_0, %c0_i32_1 : i32, i32, i32
  }
  func.func @transform_6(%arg0: i32) -> (i32, i32, i32) {
    %c0_i32 = arith.constant 0 : i32
    %c0_i32_0 = arith.constant 0 : i32
    %c0_i32_1 = arith.constant 0 : i32
    %c0_i32_2 = arith.constant 0 : i32
    return %c0_i32, %c0_i32_0, %c0_i32_1 : i32, i32, i32
  }
  func.func @transform_7(%arg0: i32) -> (i32, i32) {
    %c0_i32 = arith.constant 0 : i32
    %c0_i32_0 = arith.constant 0 : i32
    %c0_i32_1 = arith.constant 0 : i32
    return %c0_i32, %c0_i32_0 : i32, i32
  }
  func.func @transform_8(%arg0: i32) -> (i32, i32) {
    %c0_i32 = arith.constant 0 : i32
    %c0_i32_0 = arith.constant 0 : i32
    %c0_i32_1 = arith.constant 0 : i32
    return %c0_i32, %c0_i32_0 : i32, i32
  }
  func.func @transform_9(%arg0: i32) -> (i32, i32) {
    %c0_i32 = arith.constant 0 : i32
    %c0_i32_0 = arith.constant 0 : i32
    %c0_i32_1 = arith.constant 0 : i32
    return %c0_i32, %c0_i32_0 : i32, i32
  }
  func.func @transform_10(%arg0: i32) -> (i32, i32) {
    %c0_i32 = arith.constant 0 : i32
    %c0_i32_0 = arith.constant 0 : i32
    %c0_i32_1 = arith.constant 0 : i32
    return %c0_i32, %c0_i32_0 : i32, i32
  }
  func.func @transform_11(%arg0: i32) -> (i32, i32) {
    %c0_i32 = arith.constant 0 : i32
    %c0_i32_0 = arith.constant 0 : i32
    %c0_i32_1 = arith.constant 0 : i32
    return %c0_i32, %c0_i32_0 : i32, i32
  }
  func.func @transform_12(%arg0: i32) -> (i32, i32) {
    %c0_i32 = arith.constant 0 : i32
    %c0_i32_0 = arith.constant 0 : i32
    %c0_i32_1 = arith.constant 0 : i32
    return %c0_i32, %c0_i32_0 : i32, i32
  }
  func.func @transform_13(%arg0: i32) -> (i32, i32) {
    %c0_i32 = arith.constant 0 : i32
    %c0_i32_0 = arith.constant 0 : i32
    %c0_i32_1 = arith.constant 0 : i32
    return %c0_i32, %c0_i32_0 : i32, i32
  }
  func.func @transform_14(%arg0: i32) -> (i32, i32) {
    %c0_i32 = arith.constant 0 : i32
    %c0_i32_0 = arith.constant 0 : i32
    %c0_i32_1 = arith.constant 0 : i32
    return %c0_i32, %c0_i32_0 : i32, i32
  }
  func.func @transform_15(%arg0: i32) -> (i32, i32) {
    %c0_i32 = arith.constant 0 : i32
    %c0_i32_0 = arith.constant 0 : i32
    return %arg0, %c0_i32 : i32, i32
  }
}

</mosaic_0001>

<bundles_post_ra>
// kernel: tpu_custom_call.1
= control target key start
LH: loop header
LB: loop body
LE: loop exit
PB: predicated region body
PF: predicated region fallthrough
CT: control target
= control target key end

     0   :  { %s2228_s0 = inlined_call_operand.vmem [shape: bf16[16,32], index: 0, kind: input, shape index: {}]   ;;  %s2229_s1 = inlined_call_operand.vmem [shape: bf16[4,32,8], index: 1, kind: input, shape index: {}]   ;;  %s2230_s2 = inlined_call_operand.vmem [shape: f32[4,1,8], index: 2, kind: input, shape index: {}]   ;;  %s2231_s3 = inlined_call_operand.vmem [shape: bf16[4,32,8], index: 3, kind: input, shape index: {}]   ;;  %s2232_s4 = inlined_call_operand.vmem [shape: f32[4,8,1], index: 4, kind: input, shape index: {}]   ;;  %s2233_s5 = inlined_call_operand.vmem [shape: bf16[4,32,8], index: 5, kind: input, shape index: {}]   ;;  %s2234_s6 = inlined_call_operand.vmem [shape: f32[4,1,8], index: 6, kind: input, shape index: {}]   ;;  %s2235_s7 = inlined_call_operand.vmem [shape: f32[1,32], index: 7, kind: input, shape index: {}]   ;;  %s2236_s8 = inlined_call_operand.vmem [shape: f32[1,32], index: 8, kind: input, shape index: {}]   ;;  %s2237_s9 = inlined_call_operand.vmem [shape: bf16[32,128], index: 9, kind: input, shape index: {}]   ;;  %s2238_s10 = inlined_call_operand.vmem [shape: f32[1,128], index: 10, kind: input, shape index: {}]   ;;  %s2239_s11 = inlined_call_operand.vmem [shape: bf16[128,32], index: 11, kind: input, shape index: {}]   ;;  %s2240_s12 = inlined_call_operand.vmem [shape: f32[1,32], index: 12, kind: input, shape index: {}]   ;;  %s2241_s13 = inlined_call_operand.vmem [shape: f32[1,32], index: 13, kind: input, shape index: {}]   ;;  %s2242_s14 = inlined_call_operand.vmem [shape: f32[1,32], index: 14, kind: input, shape index: {}]   ;;  %s2243_s15 = inlined_call_operand.hbm [shape: bf16[16,32], index: 15, kind: output, shape index: {}]  }
   0x1   :  { %2250 = sst [smem:[#allocation12_spill]] %s2228_s0 }
   0x2   :  { %20 = vsyncpa [#allocation4], 0 }
   0x3   :  { %22 = vsyncpa [#allocation4 + $0x1], 0  ;;  %s1923_s18 = smov 0   ;;  %s1925_s19 = smov 0  }
   0x4   :  { %s1927_s20 = smov 0   ;;  %s1929_s21 = smov 0  }
   0x5 LB: > { %2251 = sst [smem:[#allocation6_spill]] %s1824_s18  ;;  %s1944_s22 = sadd.s32 4294967295, %s1836_s21   ;;  %s1836_s21 = sphi %s1929_s21, %s2263_s21   ;;  %s1832_s20 = sphi %s1927_s20, %s2265_s20   ;;  %s1828_s19 = sphi %s1925_s19, %s2267_s19   ;;  %s1824_s18 = sphi %s1923_s18, %s2266_s18  }
   0x6   : > { %2252 = sst [smem:[#allocation7_spill]] %s1832_s20  ;;  %s1486_s23 = sadd.s32 4294967294, %s1836_s21  }
   0x7   : > { %2253 = sst [smem:[#allocation8_spill]] %s1836_s21  ;;  %s1948_s24 = sadd.s32 1, %s1836_s21  }
   0x8   : > { %2254 = sst [smem:[#allocation9_spill]] %s1948_s24  ;;  %s355_s25 = sadd.s32 1, %s1832_s20 }
   0x9   : > { %s352_s26 = ssub.s32 %s1836_s21, %s1948_s24  ;;  %p365_p0 = scmp.ne.s32.totalorder %s1832_s20, %s1828_s19 }
   0xa   : > { %p353_p1 = scmp.eq.s32.totalorder %s352_s26, 0  ;;  %p366_p2 = scmp.eq.s32.totalorder %s1944_s22, 1 }
   0xb   : > { %p371_p3 = scmp.ne.s32.totalorder %s1828_s19, %s1824_s18  ;;  %p372_p4 = scmp.eq.s32.totalorder %s1486_s23, 1 }
   0xc   : > { %s1959_s27 = scalar_select %p353_p1, %s1832_s20, %s355_s25  }
   0xd   : > { %p1961_p5 = por %p366_p2, %p365_p0  ;;  %p1965_p6 = por %p372_p4, %p371_p3 }
   0xe   : > { %2255 = sst [smem:[#allocation10_spill]] %s1959_s27  ;;  %p1489_p7 = scmp.ge.s32.totalorder %s1836_s21, 1 }
   0xf   : > { %s2257_s29 = scalar_select %p1965_p6, 1, 0 }
  0x10   : > { %p439_p8 = scmp.lt.s32.totalorder %s1836_s21, 3 }
  0x11   : > { %2258 = sst [smem:[#allocation11_spill]] %s2257_s29 }
  0x12   : > { %p440_p9 = pnand %p1489_p7, %p439_p8 }
  0x13   : > { %p486_p10 = scmp.lt.s32.totalorder (!%p440_p9), %s1944_s22, 1  ;;  %s2259_s0 = sld [smem:[#allocation12_spill]] (!%p440_p9) }
  0x14   : > { %443 = sbr.rel (%p440_p9) target bundleno = 1790 (0x6fe), region = 80  ;;  %s1839_s20 = smov (!%p440_p9), 8  }
  0x15   : > { %s1840_s27 = smov (!%p440_p9), 16   ;;  %s1841_s24 = smov (!%p440_p9), 24  }
  0x16   : > { %s1650_s23 = sshll.u32 (!%p440_p9), %s1944_s22, 2 }
  0x17   : > { %s1422_s26 = scalar_lea.hbm (!%p440_p9), %s2243_s15, %s1650_s23 }
  0x19   : > { %v1665_v0 = vld [vmem:[%s2231_s3 + $0x20] sm:$0xff]  ;;  %v1667_v1 = vld [vmem:[%s2231_s3 + $0x30] sm:$0xff]  ;;  %v1656_v4 = vld [vmem:[%s2229_s1 + $0x18] sm:$0xff]  ;;  %s487_s30 = scalar_select %p486_p10, %s1944_s22, 1  ;;  %vm537_vm0 = vcmask 261120   ;;  %v1838_v21 = vmov 0  }
  0x1a   : > { %v1663_v2 = vld [vmem:[%s2231_s3 + $0x10] sm:$0xff]  ;;  %1731 = vxpose.binary.xlu0.c.b16.start [1/4] (short) (narrow) %v1667_v1, %v1665_v0, 16  ;;  %v1661_v3 = vld [vmem:[%s2231_s3] sm:$0xff]  ;;  %v1658_v6 = vld [vmem:[%s2229_s1 + $0x28] sm:$0xff]  ;;  %vm993_vm1 = vcmask 1043456   ;;  %vm989_vm2 = vcmask 64512  }
  0x1b   : > { %729 = vxpose.xlu1.c.b16.start [1/2] (short) (narrow) %v1663_v2, 16  ;;  %v1655_v5 = vld [vmem:[%s2229_s1 + $0x10] sm:$0xff]  ;;  %685 = vxpose.xlu2.c.b16.start [1/2] (short) (narrow) %v1661_v3, 16  ;;  %s1491_s25 = sshll.u32 %s487_s30, 2  ;;  %v1660_v7 = vld [vmem:[%s2229_s1 + $0x38] sm:$0xff]  ;;  %v1654_v9 = vld [vmem:[%s2229_s1 + $0x8] sm:$0xff] }
  0x1c   : > { %572 = vmatpush.bf16.msra.mxu2 %v1656_v4  ;;  %v1659_v8 = vld [vmem:[%s2229_s1 + $0x30] sm:$0xff]  ;;  %s489_s17 = scalar_lea.vmem %s2259_s0, %s1491_s25  ;;  %622 = vmatpush.bf16.msra.mxu3 %v1660_v7  ;;  %v1657_v11 = vld [vmem:[%s2229_s1 + $0x20] sm:$0xff]  ;;  %v1666_v13 = vld [vmem:[%s2231_s3 + $0x28] sm:$0xff]  ;;  %vm1200_vm3 = vcmask 130112   ;;  %vm1206_vm4 = vcmask 195712   ;;  %vm1212_vm5 = vcmask 261312  }
  0x1d   : > { %v2006_v10 = vld [vmem:[%s489_s17] sm:$0xf]  ;;  %547 = vmatpush.bf16.msra.mxu0 %v1654_v9  ;;  %v1668_v14 = vld [vmem:[%s2231_s3 + $0x38] sm:$0xff]  ;;  %v1662_v16 = vld [vmem:[%s2231_s3 + $0x8] sm:$0xff]  ;;  %s483_s17 = sand.u32 1, %s1828_s19   ;;  %s1426_s22 = sshll.u32 %s1422_s26, 4  ;;  %s1427_s22 = int_to_ptr.hbm [resolvable:$true] %s1426_s22 }
  0x1e   : > { %v539_v12 = vsel %vm537_vm0, %v2006_v10, 0  ;;  %v1664_v15 = vld [vmem:[%s2231_s3 + $0x18] sm:$0xff]  ;;  %v1653_v17 = vld [vmem:[%s2229_s1] sm:$0xff]  ;;  %v651_v18 = vld [vmem:[%s2232_s4 + $0x10] sm:$0xff]  ;;  %s1490_s30 = sshll.u32 %s483_s17, 2  ;;  %vm1409_vm13 = vcmask 257024  }
  0x1f   : > { %755 = vmatpush.bf16.xpose.msra.mxu1 %v539_v12  ;;  %v652_v19 = vld [vmem:[%s2232_s4 + $0x18] sm:$0xff]  ;;  %v650_v22 = vld [vmem:[%s2232_s4 + $0x8] sm:$0xff]  ;;  %v1671_v25 = vld [vmem:[%s2233_s5 + $0x10] sm:$0xff]  ;;  %s485_s18 = scalar_lea.vmem [#allocation3], %s1490_s30  ;;  %s1412_s21 = scalar_lea.sflag [#allocation4], %s483_s17 }
  0x20   : > { %573 = vmatpush.bf16.msra.mxu2 %v1655_v5  ;;  %623 = vmatpush.bf16.msra.mxu3 %v1659_v8  ;;  %v1672_v23 = vld [vmem:[%s2233_s5 + $0x18] sm:$0xff]  ;;  %v1674_v24 = vld [vmem:[%s2233_s5 + $0x28] sm:$0xff]  ;;  %v649_v26 = vld [vmem:[%s2232_s4] sm:$0xff]  ;;  %s1424_s16 = sshll.u32 %s485_s18, 4  ;;  %s1788_s25 = sshra.s32 %s1427_s22, 4  ;;  %s1425_s16 = int_to_ptr.vmem [resolvable:$true] %s1424_s16  ;;  %s1789_s25 = int_to_ptr.hbm [resolvable:$true] %s1788_s25 }
  0x21   : > { %548 = vmatpush.bf16.msra.mxu0 %v1653_v17  ;;  %v1673_v28 = vld [vmem:[%s2233_s5 + $0x20] sm:$0xff]  ;;  %v1676_v37 = vld [vmem:[%s2233_s5 + $0x38] sm:$0xff]  ;;  %v1675_v38 = vld [vmem:[%s2233_s5 + $0x30] sm:$0xff]  ;;  %s1794_s30 = scalar_lea.hbm %s2243_s15, 8  ;;  %p1795_p0 = scmp.lt.s32.totalorder %s1789_s25, %s2243_s15 }
  0x22   : > { %v1670_v40 = vld [vmem:[%s2233_s5 + $0x8] sm:$0xff]  ;;  %v1669_v41 = vld [vmem:[%s2233_s5] sm:$0xff] }
  0x23   : > { %1509 = vmatmul.msk.bf16.vlgmr.msra.gmra.mxu2 %vm537_vm0, %v2006_v10  ;;  %1527 = vmatmul.msk.bf16.vlgmr.msra.gmra.mxu3 %vm537_vm0, %v2006_v10  ;;  %v1741_v44 = vld [vmem:[%s2230_s2] ss:$0 sm:$0xff]  ;;  %v1738_v51 = vld [vmem:[%s2230_s2 + $0x1] ss:$0 sm:$0xff]  ;;  %v1739_v57 = vld [vmem:[%s2230_s2 + $0x2] ss:$0 sm:$0xff] }
  0x24   : > { %597 = vmatpush.bf16.msrb.mxu2 %v1658_v6  ;;  %843 = vmatpush.bf16.xpose.msrb.mxu3 %v539_v12  ;;  %v1740_v2 = vld [vmem:[%s2230_s2 + $0x3] ss:$0 sm:$0xff] }
  0x25   : > { %711 = vmatpush.bf16.xpose.msrb.mxu0 %v539_v12 }
  0x26   : > { %1500 = vmatmul.msk.bf16.vlgmr.msra.gmra.mxu0 %vm537_vm0, %v2006_v10 }
  0x27   : > { %924 = vmatpush.bf16.msrb.mxu1 %v1672_v23 }
  0x28   : > { %598 = vmatpush.bf16.msrb.mxu2 %v1657_v11 }
  0x2a   : > { %1732 = vxpose.binary.xlu0.c.b16.end [2/4] (short) (narrow) %v1668_v14, %v1666_v13, 16  ;;  %v1742_v14 = vld [vmem:[%s2234_s6 + $0x1] ss:$0 sm:$0xff] }
  0x2b   : > { %730 = vxpose.xlu1.c.b16.end [2/2] (short) (narrow) %v1664_v15, 16  ;;  %686 = vxpose.xlu2.c.b16.end [2/2] (short) (narrow) %v1662_v16, 16 }
  0x2c   : > { %799 = vmatpush.bf16.xpose.msra.mxu2 %v539_v12  ;;  %925 = vmatpush.bf16.msrb.mxu1 %v1671_v25 }
  0x2d   : > { %974 = vmatpush.bf16.msra.mxu3 %v1676_v37  ;;  %899 = vmatpush.bf16.msra.mxu0 %v1670_v40 }
  0x31   : > { %975 = vmatpush.bf16.msra.mxu3 %v1675_v38  ;;  %900 = vmatpush.bf16.msra.mxu0 %v1669_v41 }
  0x33   : > { %1518 = vmatmul.msk.bf16.vlgmr.msrb.gmra.mxu2 %vm537_vm0, %v2006_v10 }
  0x34   : > { %949 = vmatpush.bf16.msrb.mxu2 %v1674_v24 }
  0x38   : > { %950 = vmatpush.bf16.msrb.mxu2 %v1673_v28 }
  0x7e   : > { %1736 = vset.pattern.permute.xlu1 %v1838_v21 }
  0x85   : > { %670 = vperm.xlu1 %1736, %v652_v19  }
  0x8d   : > { %1737 = vset.pattern.permute.xlu2 %v1838_v21  ;;  %655 = vperm.xlu1 %1736, %v649_v26  }
  0x91   : > { %1735 = vset.pattern.permute.xlu0 %v1838_v21 }
  0x94   : > { %660 = vperm.xlu2 %1737, %v650_v22   ;;  %v1743_v22 = vld [vmem:[%s2234_s6 + $0x2] ss:$0 sm:$0xff] }
  0x98   : > { %665 = vperm.xlu0 %1735, %v651_v18  }
  0xa3   : > { %v550_v39 = vpop.f32.mrf.mxu0 }
  0xa4   : > { %v551_v45 = vadd.f32 %v1741_v44, %v550_v39 }
  0xa6   : > { %v575_v20 = vpop.f32.mrf.mxu2  ;;  %v2060_v29 = vpop.f32.mrf.mxu3  ;;  %v629_v48 = vmul.f32 0.17677669, %v551_v45 }
  0xa7   : > { %v576_v56 = vadd.f32 %v1738_v51, %v575_v20  ;;  %v626_v8 = vadd.f32 %v1740_v2, %v2060_v29 }
  0xa8   : > { %v981_v52 = vpack.c.bf16 %v629_v48, %v629_v48 }
  0xa9   : > { %v630_v60 = vmul.f32 0.17677669, %v576_v56  ;;  %v632_v15 = vmul.f32 0.17677669, %v626_v8 }
  0xab   : > { %v552_v43 = vpop.f32.mrf.mxu0  ;;  %v982_v4 = vpack.c.bf16 %v630_v60, %v630_v60  ;;  %v984_v20 = vpack.c.bf16 %v632_v15, %v632_v15 }
  0xae   : > { %v577_v27 = vpop.f32.mrf.mxu2  ;;  %v627_v32 = vpop.f32.mrf.mxu3 }
  0xaf   : > { %v1744_v32 = vld [vmem:[%s2234_s6] ss:$0 sm:$0xff] }
  0xb6   : > { %v600_v31 = vpop.f32.mrf.mxu2 }
  0xb7   : > { %v601_v63 = vadd.f32 %v1739_v57, %v600_v31 }
  0xb9   : > { %v631_v5 = vmul.f32 0.17677669, %v601_v63 }
  0xbb   : > { %v983_v11 = vpack.c.bf16 %v631_v5, %v631_v5 }
  0xbc   : > { %v693_v30 = vpop.trf.xlu2 }
  0xbd   : > { %1536 = vmatmul.msk.bf16.vlgmr.msrb.gmra.mxu0 %vm537_vm0, %v693_v30 }
  0xbe   : > { %v602_v35 = vpop.f32.mrf.mxu2 }
  0xc6   : > { %v1733_v33 = vpop.trf.xlu0 }
  0xc7   : > { %v737_v34 = vpop.trf.xlu1  ;;  %1554 = vmatmul.msk.bf16.vlgmr.msra.gmra.mxu2 %vm537_vm0, %v1733_v33  ;;  %v1745_v33 = vld [vmem:[%s2234_s6 + $0x3] ss:$0 sm:$0xff] }
  0xc8   : > { %1545 = vmatmul.msk.bf16.vlgmr.msra.gmra.mxu1 %vm537_vm0, %v737_v34 }
  0xcd   : > { %1572 = vmatmul.msk.bf16.vlgmr.msra.gmra.mxu0 %vm537_vm0, %v2006_v10 }
  0xce   : > { %v1734_v36 = vpop.trf.xlu0 }
  0xcf   : > { %1563 = vmatmul.msk.bf16.vlgmr.msrb.gmra.mxu3 %vm537_vm0, %v1734_v36 }
  0xd7   : > { %1590 = vmatmul.msk.bf16.vlgmr.msrb.gmra.mxu2 %vm537_vm0, %v2006_v10 }
  0xd8   : > { %1581 = vmatmul.msk.bf16.vlgmr.msrb.gmra.mxu1 %vm537_vm0, %v2006_v10 }
  0xdf   : > { %1599 = vmatmul.msk.bf16.vlgmr.msra.gmra.mxu3 %vm537_vm0, %v2006_v10 }
  0xee   : > { %v661_v54 = vpop.permute.xlu2 %660 }
  0xf7   : > { %v671_v42 = vpop.permute.xlu1 %670 }
  0xff   : > { %v656_v46 = vpop.permute.xlu1 %655 }
 0x10a   : > { %v666_v62 = vpop.permute.xlu0 %665 }
 0x13a   : > { %v713_v47 = vpop.f32.mrf.mxu0 }
 0x13b   : > { %v714_v49 = vadd.f32 %v713_v47, %v656_v46 }
 0x13d   : > { %v985_v50 = vpack.c.bf16 %v714_v49, %v714_v49 }
 0x13f   : > { %v995_v53 = vsel %vm993_vm1, %v985_v50, 0 }
 0x140   : > { %1004 = vmatpush.bf16.msrb.mxu0 %v995_v53 }
 0x142   : > { %v715_v55 = vpop.f32.mrf.mxu0 }
 0x143   : > { %1600 = vmatmul.msk.bf16.vlgmr.msrb.gmra.mxu0 %vm989_vm2, %v981_v52 }
 0x145   : > { %v757_v58 = vpop.f32.mrf.mxu1 }
 0x146   : > { %v758_v59 = vadd.f32 %v757_v58, %v661_v54 }
 0x148   : > { %v986_v61 = vpack.c.bf16 %v758_v59, %v758_v59 }
 0x14a   : > { %v1014_v0 = vsel %vm993_vm1, %v986_v61, 0  ;;  %v801_v1 = vpop.f32.mrf.mxu2  ;;  %v902_v34 = vpop.f32.mrf.mxu0 }
 0x14b   : > { %v802_v3 = vadd.f32 %v801_v1, %v666_v62  ;;  %1023 = vmatpush.bf16.msra.mxu1 %v1014_v0  ;;  %v903_v36 = vadd.f32 %v1744_v32, %v902_v34 }
 0x14d   : > { %v987_v6 = vpack.c.bf16 %v802_v3, %v802_v3  ;;  %v759_v7 = vpop.f32.mrf.mxu1  ;;  %v1115_v38 = vpack.c.bf16 %v903_v36, %v903_v36 }
 0x14e   : > { %1601 = vmatmul.msk.bf16.vlgmr.msra.gmra.mxu1 %vm989_vm2, %v982_v4 }
 0x14f   : > { %v1033_v9 = vsel %vm993_vm1, %v987_v6, 0  ;;  %v1123_v40 = vsel %vm993_vm1, %v1115_v38, 0 }
 0x150   : > { %1042 = vmatpush.bf16.msra.mxu2 %v1033_v9  ;;  %1132 = vmatpush.bf16.msra.mxu0 %v1123_v40  ;;  %v492_v40 = vunpack.c.l.bf16 %v2006_v10 }
 0x152   : > { %v803_v12 = vpop.f32.mrf.mxu2  ;;  %v845_v13 = vpop.f32.mrf.mxu3 }
 0x153   : > { %v846_v16 = vadd.f32 %v845_v13, %v671_v42  ;;  %1602 = vmatmul.msk.bf16.vlgmr.msra.gmra.mxu2 %vm989_vm2, %v983_v11  ;;  %v904_v42 = vpop.f32.mrf.mxu0 }
 0x155   : > { %v988_v17 = vpack.c.bf16 %v846_v16, %v846_v16  ;;  %v927_v18 = vpop.f32.mrf.mxu1 }
 0x156   : > { %v928_v19 = vadd.f32 %v1742_v14, %v927_v18 }
 0x157   : > { %v1052_v21 = vsel %vm993_vm1, %v988_v17, 0 }
 0x158   : > { %1061 = vmatpush.bf16.msrb.mxu3 %v1052_v21  ;;  %v1116_v23 = vpack.c.bf16 %v928_v19, %v928_v19 }
 0x15a   : > { %v847_v24 = vpop.f32.mrf.mxu3  ;;  %v1142_v25 = vsel %vm993_vm1, %v1116_v23, 0  ;;  %v952_v26 = vpop.f32.mrf.mxu2 }
 0x15b   : > { %1603 = vmatmul.msk.bf16.vlgmr.msrb.gmra.mxu3 %vm989_vm2, %v984_v20  ;;  %v953_v27 = vadd.f32 %v1743_v22, %v952_v26  ;;  %1151 = vmatpush.bf16.msrb.mxu1 %v1142_v25 }
 0x15d   : > { %v929_v28 = vpop.f32.mrf.mxu1  ;;  %v1117_v29 = vpack.c.bf16 %v953_v27, %v953_v27 }
 0x15f   : > { %v1161_v30 = vsel %vm993_vm1, %v1117_v29, 0 }
 0x160   : > { %1170 = vmatpush.bf16.msrb.mxu2 %v1161_v30 }
 0x162   : > { %v954_v31 = vpop.f32.mrf.mxu2  ;;  %v977_v35 = vpop.f32.mrf.mxu3 }
 0x163   : > { %v978_v37 = vadd.f32 %v1745_v33, %v977_v35 }
 0x165   : > { %v1118_v39 = vpack.c.bf16 %v978_v37, %v978_v37 }
 0x167   : > { %v1180_v41 = vsel %vm993_vm1, %v1118_v39, 0 }
 0x168   : > { %1189 = vmatpush.bf16.msra.mxu3 %v1180_v41 }
 0x16a   : > { %v979_v43 = vpop.f32.mrf.mxu3 }
 0x1c0   : > { %v1006_v44 = vpop.f32.mrf.mxu0 }
 0x1c1   : > { %v1067_v51 = vsel %vm989_vm2, %v1006_v44, -inf }
 0x1c8   : > { %v1008_v45 = vpop.f32.mrf.mxu0 }
 0x1cb   : > { %v1025_v46 = vpop.f32.mrf.mxu1 }
 0x1cc   : > { %v1070_v47 = vsel %vm989_vm2, %v1025_v46, -inf }
 0x1cd   : > { %1071 = vmax.xlane.f32.xlu0 %v1070_v47 }
 0x1d3   : > { %v1027_v48 = vpop.f32.mrf.mxu1 }
 0x1d6   : > { %v1044_v49 = vpop.f32.mrf.mxu2 }
 0x1d7   : > { %v1073_v50 = vsel %vm989_vm2, %v1044_v49, -inf }
 0x1d8   : > { %1074 = vmax.xlane.f32.xlu1 %v1073_v50 }
 0x1de   : > { %v1046_v52 = vpop.f32.mrf.mxu2  ;;  %v1063_v53 = vpop.f32.mrf.mxu3 }
 0x1df   : > { %v1076_v54 = vsel %vm989_vm2, %v1063_v53, -inf }
 0x1e0   : > { %1077 = vmax.xlane.f32.xlu2 %v1076_v54  ;;  %1068 = vmax.xlane.f32.xlu1 %v1067_v51 }
 0x1e6   : > { %v1065_v55 = vpop.f32.mrf.mxu3 }
 0x1e7   : > { %v1678_v55 = vld [vmem:[%s2237_s9 + $0x8] sm:$0xff] }
 0x1e8   : > { %1285 = vmatpush.bf16.msrb.mxu0 %v1678_v55 }
 0x240   : > { %v1072_v56 = vpop.xlane.xlu0 %1071 }
 0x241   : > { %v1080_v57 = vsub.f32 %v1025_v46, %v1072_v56  ;;  %v1677_v56 = vld [vmem:[%s2237_s9] sm:$0xff] }
 0x242   : > { %1286 = vmatpush.bf16.msrb.mxu0 %v1677_v56 }
 0x243   : > { %v1085_v58 = vmul.f32 1.442695, %v1080_v57  ;;  %v1686_v57 = vld [vmem:[%s2239_s11 + $0x38] sm:$0xff] }
 0x244   : > { %1362 = vmatpush.bf16.msra.mxu1 %v1686_v57 }
 0x245   : > { %1752 = vpow2.f32 %v1085_v58 }
 0x24b   : > { %v1753_v59 = vpop.eup %1752  ;;  %v1075_v60 = vpop.xlane.xlu1 %1074 }
 0x24c   : > { %v1081_v61 = vsub.f32 %v1044_v49, %v1075_v60  ;;  %v1094_v62 = vsel %vm989_vm2, %v1753_v59, 0.0  ;;  %v1685_v60 = vld [vmem:[%s2239_s11 + $0x30] sm:$0xff] }
 0x24d   : > { %1095 = vadd.xlane.f32.xlu0 %v1094_v62  ;;  %1363 = vmatpush.bf16.msra.mxu1 %v1685_v60  ;;  %v1684_v62 = vld [vmem:[%s2239_s11 + $0x28] sm:$0xff] }
 0x24e   : > { %v1087_v63 = vmul.f32 1.442695, %v1081_v61 }
 0x250   : > { %1754 = vpow2.f32 %v1087_v63  ;;  %v1683_v63 = vld [vmem:[%s2239_s11 + $0x20] sm:$0xff] }
 0x251   : > { %1364 = vmatpush.bf16.msra.mxu1 %v1684_v62 }
 0x253   : > { %v1078_v0 = vpop.xlane.xlu2 %1077  ;;  %v1069_v1 = vpop.xlane.xlu1 %1068 }
 0x254   : > { %v1082_v2 = vsub.f32 %v1063_v53, %v1078_v0  ;;  %v1079_v3 = vsub.f32 %v1006_v44, %v1069_v1  ;;  %v1842_v44 = vmov 32.0  }
 0x255   : > { %1365 = vmatpush.bf16.msra.mxu1 %v1683_v63 }
 0x256   : > { %v1755_v4 = vpop.eup %1754  ;;  %v1089_v5 = vmul.f32 1.442695, %v1082_v2  ;;  %v1083_v6 = vmul.f32 1.442695, %v1079_v3  ;;  %v1682_v2 = vld [vmem:[%s2239_s11 + $0x18] sm:$0xff] }
 0x257   : > { %v1097_v7 = vsel %vm989_vm2, %v1755_v4, 0.0 }
 0x258   : > { %1756 = vpow2.f32 %v1089_v5  ;;  %1098 = vadd.xlane.f32.xlu2 %v1097_v7  ;;  %v1681_v5 = vld [vmem:[%s2239_s11 + $0x10] sm:$0xff] }
 0x259   : > { %1758 = vpow2.f32 %v1083_v6  ;;  %1366 = vmatpush.bf16.msra.mxu1 %v1682_v2 }
 0x25d   : > { %1367 = vmatpush.bf16.msra.mxu1 %v1681_v5 }
 0x25e   : > { %v1757_v8 = vpop.eup %1756 }
 0x25f   : > { %v1759_v9 = vpop.eup %1758  ;;  %v1100_v11 = vsel %vm989_vm2, %v1757_v8, 0.0 }
 0x260   : > { %1101 = vadd.xlane.f32.xlu1 %v1100_v11  ;;  %v1091_v12 = vsel %vm989_vm2, %v1759_v9, 0.0  ;;  %v1747_v11 = vld [vmem:[%s2236_s8] ss:$0 sm:$0xff] }
 0x261   : > { %1092 = vadd.xlane.f32.xlu2 %v1091_v12 }
 0x2c0   : > { %v1096_v13 = vpop.xlane.xlu0 %1095 }
 0x2c1   : > { %1760 = vrcp.f32 %v1096_v13 }
 0x2c7   : > { %v1761_v14 = vpop.eup %1760 }
 0x2c8   : > { %v1108_v15 = vmul.f32 %v1761_v14, %v1753_v59 }
 0x2ca   : > { %v1112_v16 = vpack.c.bf16 %v1108_v15, %v1108_v15 }
 0x2cb   : > { %v1099_v17 = vpop.xlane.xlu2 %1098 }
 0x2cc   : > { %1762 = vrcp.f32 %v1099_v17  ;;  %1605 = vmatmul.msk.bf16.vlgmr.msrb.gmra.mxu1 %vm989_vm2, %v1112_v16  ;;  %v1680_v16 = vld [vmem:[%s2239_s11 + $0x8] sm:$0xff]  ;;  %v1679_v17 = vld [vmem:[%s2239_s11] sm:$0xff] }
 0x2cd   : > { %1368 = vmatpush.bf16.msra.mxu1 %v1680_v16 }
 0x2d1   : > { %1369 = vmatpush.bf16.msra.mxu1 %v1679_v17 }
 0x2d2   : > { %v1763_v18 = vpop.eup %1762 }
 0x2d3   : > { %v1109_v19 = vmul.f32 %v1763_v18, %v1755_v4  ;;  %v1102_v20 = vpop.xlane.xlu1 %1101  ;;  %v1748_v18 = vld [vmem:[%s2238_s10] ss:$0 sm:$0xff] }
 0x2d4   : > { %v1093_v21 = vpop.xlane.xlu2 %1092  ;;  %1764 = vrcp.f32 %v1102_v20 }
 0x2d5   : > { %v1113_v22 = vpack.c.bf16 %v1109_v19, %v1109_v19  ;;  %1766 = vrcp.f32 %v1093_v21 }
 0x2d6   : > { %1768 = vrcp.f32 %v1842_v44  ;;  %v1750_v44 = vld [vmem:[%s2241_s13] ss:$0 sm:$0xff] }
 0x2d7   : > { %1606 = vmatmul.msk.bf16.vlgmr.msrb.gmra.mxu2 %vm989_vm2, %v1113_v22 }
 0x2da   : > { %v1765_v23 = vpop.eup %1764 }
 0x2db   : > { %v1767_v24 = vpop.eup %1766  ;;  %v1110_v25 = vmul.f32 %v1765_v23, %v1757_v8  ;;  %v1746_v8 = vld [vmem:[%s2235_s7] ss:$0 sm:$0xff] }
 0x2dc   : > { %v1107_v26 = vmul.f32 %v1767_v24, %v1759_v9  ;;  %v1769_v45 = vpop.eup %1768  ;;  %v1749_v24 = vld [vmem:[%s2240_s12] ss:$0 sm:$0xff] }
 0x2dd   : > { %v1114_v27 = vpack.c.bf16 %v1110_v25, %v1110_v25  ;;  %v1222_v46 = vmul.f32 32.0, %v1769_v45  ;;  %vm1226_vm6 = vweird.f32 %v1769_v45 }
 0x2de   : > { %v1111_v28 = vpack.c.bf16 %v1107_v26, %v1107_v26 }
 0x2df   : > { %1607 = vmatmul.msk.bf16.vlgmr.msra.gmra.mxu3 %vm989_vm2, %v1114_v27  ;;  %v1223_v47 = vsub.f32 1.0, %v1222_v46 }
 0x2e0   : > { %1604 = vmatmul.msk.bf16.vlgmr.msra.gmra.mxu0 %vm989_vm2, %v1111_v28 }
 0x2e1   : > { %v1224_v48 = vmul.f32 %v1769_v45, %v1223_v47  ;;  %v1751_v47 = vld [vmem:[%s2242_s14] ss:$0 sm:$0xff] }
 0x2e3   : > { %v1225_v49 = vadd.f32 %v1769_v45, %v1224_v48 }
 0x2e5   : > { %v2138_v50 = vsel %vm1226_vm6, %v1769_v45, %v1225_v49 }
 0x349   : > { %v1153_v29 = vpop.f32.mrf.mxu1 }
 0x34a   : > { %1197 = vrot.lane.b32.xlu1 %v1153_v29, %s1839_s20  ;;  %s1790_s20 = scalar_lea.hbm %s1789_s25, 4 }
 0x34b   : > { %p1791_p11 = scmp.ne.s32.totalorder %s1789_s25, %s1790_s20  ;;  %p1796_p1 = scmp.lt.s32.totalorder %s1794_s30, %s1790_s20 }
 0x34d   : > { %p1792_p12 = pnand %p1791_p11, %p1961_p5  ;;  %p1797_p2 = por %p1796_p1, %p1795_p0 }
 0x34f   : > { %p1793_p13 = pneg %p1792_p12 }
 0x351   : > { %v1155_v30 = vpop.f32.mrf.mxu1  ;;  %p1798_p3 = pnand %p1797_p2, %p1793_p13 }
 0x35a   : > { %v1172_v31 = vpop.f32.mrf.mxu2 }
 0x35b   : > { %1203 = vrot.lane.b32.xlu0 %v1172_v31, %s1840_s27 }
 0x35d   : > { %v1134_v32 = vpop.f32.mrf.mxu0 }
 0x35e   : > { %1195 = vst.msk [vmem:[#allocation2] sm:$0xff] %vm989_vm2, %v1134_v32 }
 0x362   : > { %v1174_v33 = vpop.f32.mrf.mxu2  ;;  %v1191_v34 = vpop.f32.mrf.mxu3 }
 0x363   : > { %1209 = vrot.lane.b32.xlu2 %v1191_v34, %s1841_s24 }
 0x365   : > { %v1136_v35 = vpop.f32.mrf.mxu0 }
 0x36a   : > { %v1193_v36 = vpop.f32.mrf.mxu3 }
 0x3bc   : > { %v1198_v37 = vpop.permute.xlu1 %1197 }
 0x3bd   : > { %1201 = vst.msk [vmem:[#allocation2] sm:$0xff] %vm1200_vm3, %v1198_v37  ;;  %v1210_v39 = vpop.permute.xlu2 %1209 }
 0x3cd   : > { %v1204_v38 = vpop.permute.xlu0 %1203 }
 0x3ce   : > { %1207 = vst.msk [vmem:[#allocation2] sm:$0xff] %vm1206_vm4, %v1204_v38 }
 0x3cf   : > { %1213 = vst.msk [vmem:[#allocation2] sm:$0xff] %vm1212_vm5, %v1210_v39 }
 0x3d6   : > { %v1214_v41 = vld [vmem:[#allocation2] sm:$0xff] }
 0x3d7   : > { %v1215_v42 = vadd.f32 %v1214_v41, %v492_v40 }
 0x3d9   : > { %v1218_v43 = vsel %vm537_vm0, %v1215_v42, 0.0 }
 0x3da   : > { %1219 = vadd.xlane.f32.xlu0 %v1218_v43 }
 0x44d   : > { %v1220_v51 = vpop.xlane.xlu0 %1219 }
 0x44e   : > { %v1228_v52 = vmul.f32 %v2138_v50, %v1220_v51 }
 0x450   : > { %v1229_v53 = vsub.f32 %v1215_v42, %v1228_v52 }
 0x452   : > { %v1230_v10 = vmul.f32 %v1229_v53, %v1229_v53 }
 0x454   : > { %v1231_v54 = vsel %vm537_vm0, %v1230_v10, 0.0 }
 0x455   : > { %1232 = vadd.xlane.f32.xlu1 %v1231_v54 }
 0x4c8   : > { %v1233_v58 = vpop.xlane.xlu1 %1232 }
 0x4c9   : > { %v1234_v59 = vmul.f32 %v1233_v58, %v2138_v50 }
 0x4cb   : > { %v1235_v61 = vadd.f32 1e-05, %v1234_v59 }
 0x4cd   : > { %1770 = vrsqrt.f32 %v1235_v61  ;;  %vm1242_vm8 = vweird.f32 %v1235_v61 }
 0x4d3   : > { %v1771_v0 = vpop.eup %1770 }
 0x4d4   : > { %v1237_v1 = vmul.f32 %v1771_v0, %v1235_v61  ;;  %vm1243_vm7 = vweird.f32 %v1771_v0 }
 0x4d5   : > { %vm1244_vm9 = vmor %vm1242_vm8, %vm1243_vm7 }
 0x4d6   : > { %v1238_v3 = vmul.f32 %v1771_v0, %v1237_v1 }
 0x4d8   : > { %v1239_v4 = vmul.f32 0.5, %v1238_v3 }
 0x4da   : > { %v1240_v6 = vsub.f32 1.5, %v1239_v4 }
 0x4dc   : > { %v1241_v7 = vmul.f32 %v1771_v0, %v1240_v6 }
 0x4de   : > { %v1245_v9 = vsel %vm1244_vm9, %v1771_v0, %v1241_v7 }
 0x4df   : > { %v1246_v12 = vmul.f32 %v1245_v9, %v1229_v53 }
 0x4e1   : > { %v1250_v13 = vmul.f32 %v1746_v8, %v1246_v12 }
 0x4e3   : > { %v1254_v14 = vadd.f32 %v1747_v11, %v1250_v13 }
 0x4e5   : > { %v1255_v15 = vpack.c.bf16 %v1254_v14, %v1254_v14 }
 0x4e7   : > { %1616 = vmatmul.msk.bf16.vlgmr.msrb.gmra.mxu0 %vm537_vm0, %v1255_v15 }
 0x564   : > { %v1288_v19 = vpop.f32.mrf.mxu0 }
 0x565   : > { %v1289_v20 = vadd.f32 %v1748_v18, %v1288_v19 }
 0x567   : > { %v1292_v21 = vmax.f32 %v1289_v20, 0.0 }
 0x569   : > { %v1293_v22 = vpack.c.bf16 %v1292_v21, %v1292_v21 }
 0x56b   : > { %1370 = vmatmul.bf16.vlgmr.msra.gmra.mxu1 %v1293_v22 }
 0x56c   : > { %v1290_v23 = vpop.f32.mrf.mxu0 }
 0x5e8   : > { %v1371_v25 = vpop.f32.mrf.mxu1 }
 0x5e9   : > { %v1372_v26 = vadd.f32 %v1749_v24, %v1371_v25 }
 0x5eb   : > { %v1375_v27 = vadd.f32 %v1372_v26, %v1254_v14 }
 0x5ed   : > { %v1378_v28 = vsel %vm537_vm0, %v1375_v27, 0.0 }
 0x5ee   : > { %1379 = vadd.xlane.f32.xlu2 %v1378_v28 }
 0x5f0   : > { %v1373_v29 = vpop.f32.mrf.mxu1 }
 0x661   : > { %v1380_v30 = vpop.xlane.xlu2 %1379 }
 0x662   : > { %v1381_v31 = vmul.f32 %v1380_v30, %v2138_v50 }
 0x664   : > { %v1382_v32 = vsub.f32 %v1375_v27, %v1381_v31 }
 0x666   : > { %v1383_v33 = vmul.f32 %v1382_v32, %v1382_v32 }
 0x668   : > { %v1384_v34 = vsel %vm537_vm0, %v1383_v33, 0.0 }
 0x669   : > { %1385 = vadd.xlane.f32.xlu0 %v1384_v34 }
 0x6dc   : > { %v1386_v35 = vpop.xlane.xlu0 %1385 }
 0x6dd   : > { %v1387_v36 = vmul.f32 %v1386_v35, %v2138_v50 }
 0x6df   : > { %v1388_v37 = vadd.f32 1e-05, %v1387_v36 }
 0x6e1   : > { %1772 = vrsqrt.f32 %v1388_v37  ;;  %vm1395_vm11 = vweird.f32 %v1388_v37 }
 0x6e7   : > { %v1773_v38 = vpop.eup %1772 }
 0x6e8   : > { %v1390_v39 = vmul.f32 %v1773_v38, %v1388_v37  ;;  %vm1396_vm10 = vweird.f32 %v1773_v38 }
 0x6e9   : > { %vm1397_vm12 = vmor %vm1395_vm11, %vm1396_vm10 }
 0x6ea   : > { %v1391_v40 = vmul.f32 %v1773_v38, %v1390_v39 }
 0x6ec   : > { %v1392_v41 = vmul.f32 0.5, %v1391_v40 }
 0x6ee   : > { %v1393_v42 = vsub.f32 1.5, %v1392_v41 }
 0x6f0   : > { %v1394_v43 = vmul.f32 %v1773_v38, %v1393_v42 }
 0x6f2   : > { %v1398_v45 = vsel %vm1397_vm12, %v1773_v38, %v1394_v43 }
 0x6f3   : > { %v1399_v46 = vmul.f32 %v1398_v45, %v1382_v32 }
 0x6f5   : > { %v1403_v48 = vmul.f32 %v1750_v44, %v1399_v46 }
 0x6f7   : > { %v1407_v49 = vadd.f32 %v1751_v47, %v1403_v48 }
 0x6f9   : > { %v1408_v50 = vpack.c.bf16 %v1407_v49, %v1407_v49 }
 0x6fb   : > { %1410 = vst.msk [vmem:[%s485_s18] sm:$0xf] %vm1409_vm13, %v1408_v50 }
 0x6fc   : > { %1801 = shalt.err (!%p1798_p3)
}
 0x6fd   : > { %1687 = dma.vmem_to_hbm [thread:$0]  (%p1961_p5), %s1425_s16, 64, %s1427_s22, %s1412_s21  }
 0x6fe PF: > { %s2260_s17 = sld [smem:[#allocation8_spill]] }
 0x6ff   : > { %s2261_s26 = sld [smem:[#allocation6_spill]] }
 0x704   : > { %p1693_p4 = scmp.ge.s32.totalorder %s2260_s17, 2 }
 0x705   : > { %s1438_s0 = sand.u32 1, %s2261_s26  }
 0x706   : > { %p1690_p7 = pnand %p1693_p4, %p1965_p6  ;;  %s1439_s23 = scalar_lea.sflag [#allocation4], %s1438_s0 }
 0x708   : > { %p1691_p8 = pneg %p1690_p7 }
 0x70a   : > { %1819 = dma.done.wait (%p1691_p8), %s1439_s23, 64  }
 0x70b   : > { %1821 = vsyncadd (%p1691_p8), %s1439_s23, 4294967232  ;;  %s2263_s21 = sld [smem:[#allocation9_spill]]  ;;  %s2266_s18 = smov %s1828_s19 }
 0x70c   : > { %s2264_s25 = sld [smem:[#allocation7_spill]] }
 0x70d   : > { %s2265_s20 = sld [smem:[#allocation10_spill]] }
 0x711   : > { %p25_p9 = scmp.ge.s32.totalorder %s2263_s21, 4  }
 0x712   : > { %s2267_s19 = smov %s2264_s25 }
 0x713   :  { %27 = sbr.rel (!%p25_p9) target bundleno = 5 (0x5), region = 115 }
 0x718   :  { %1445 = vsyncpa [#allocation4], 1 }
 0x719   :  { %1447 = vsyncpa [#allocation4 + $0x1], 1 }

</bundles_post_ra>
